<compile_context>
chip_gen: v5e
topology: v5e:2x2
jax: 0.10.0
libtpu: 0.0.40
codegen_flags: <defaults>
</compile_context>

<pallas_src>
import jax
import jax.numpy as jnp
from jax.experimental import pallas as pl
from jax.experimental.pallas import tpu as pltpu


def _bilinear_kernel(x1t_ref, a_ref, x0_ref, wl_ref, bl_ref, wrt_ref, br_ref,
                     o_ref, acc_ref):
    bt = a_ref.shape[0]          # batches resident this grid step (static)
    l = wl_ref.shape[0]          # left-linear output dim

    wl = wl_ref[...]             # (L, Q)
    bl = bl_ref[...]             # (L, 1)

    # Per-batch contractions (over P and over R). Fully unrolled: bt is a small
    # compile-time constant. Every dot is a plain A @ B -- no transposes.
    for b in range(bt):
        # x1_A = x1^T @ A : (Q, P) @ (P, R) -> (Q, R)
        x1_a = jnp.dot(x1t_ref[b], a_ref[b], preferred_element_type=jnp.float32)
        # Left linear in transposed form: W2_x1_A^T = wl @ x1_A + bl_col : (L, R)
        w2_t = jnp.dot(wl, x1_a, preferred_element_type=jnp.float32) + bl
        # W2_x1_A^T @ x0 : (L, R) @ (R, C) -> (L, C); stack into (Bt*L, C)
        acc_ref[b * l:(b + 1) * l, :] = jnp.dot(
            w2_t, x0_ref[b], preferred_element_type=jnp.float32)

    # Right linear stacked across the Bt batches: one MXU call + one block store.
    pre = jnp.dot(acc_ref[...], wrt_ref[...],
                  preferred_element_type=jnp.float32) + br_ref[...]
    o_ref[...] = jnp.maximum(pre, 0.0).astype(o_ref.dtype)


def _choose_batch_tile(batch, max_bt=32):
    # Largest divisor of `batch` <= min(max_bt, batch // 2) so the grid keeps
    # >= 2 steps (lets v7x's two TensorCores both work); falls back to 1.
    target = min(max_bt, max(1, batch // 2))
    for bt in range(target, 0, -1):
        if batch % bt == 0:
            return bt
    return 1


def bilinear_layer(A, x0, x1, w_left, b_left, w_right, b_right):
    B, P, R = A.shape
    _, _, C = x0.shape           # x0: (B, R, C)
    _, _, Q = x1.shape           # x1: (B, P, Q)
    L = w_left.shape[0]          # left linear:  Q -> L    (weight (L, Q))
    Rout = w_right.shape[0]      # right linear: C -> Rout (weight (Rout, C))

    Bt = _choose_batch_tile(B)
    grid = (B // Bt,)

    # One-time layout plumbing in XLA (hoisted out of the kernel):
    x1_t = jnp.swapaxes(x1, 1, 2)            # (B, Q, P)
    wr_t = jnp.transpose(w_right)            # (C, Rout)
    bl_col = b_left.reshape(L, 1)            # (L, 1)
    br_row = b_right.reshape(1, Rout)        # (1, Rout)

    flops = 2 * B * (Q * P * R + L * Q * R + L * R * C + L * C * Rout)
    bytes_accessed = 4 * (A.size + x0.size + x1.size + w_left.size +
                          b_left.size + w_right.size + b_right.size +
                          B * L * Rout)

    out2d = pl.pallas_call(
        _bilinear_kernel,
        out_shape=jax.ShapeDtypeStruct((B * L, Rout), jnp.float32),
        grid_spec=pltpu.PrefetchScalarGridSpec(
            num_scalar_prefetch=0,
            grid=grid,
            in_specs=[
                pl.BlockSpec((Bt, Q, P), lambda i: (i, 0, 0)),   # x1^T
                pl.BlockSpec((Bt, P, R), lambda i: (i, 0, 0)),   # A
                pl.BlockSpec((Bt, R, C), lambda i: (i, 0, 0)),   # x0
                pl.BlockSpec((L, Q), lambda i: (0, 0)),          # w_left
                pl.BlockSpec((L, 1), lambda i: (0, 0)),          # b_left (col)
                pl.BlockSpec((C, Rout), lambda i: (0, 0)),       # w_right^T
                pl.BlockSpec((1, Rout), lambda i: (0, 0)),       # b_right (row)
            ],
            out_specs=pl.BlockSpec((Bt * L, Rout), lambda i: (i, 0)),
            scratch_shapes=[pltpu.VMEM((Bt * L, C), jnp.float32)],
        ),
        compiler_params=pltpu.CompilerParams(
            dimension_semantics=("parallel",)),
        cost_estimate=pl.CostEstimate(
            flops=flops, transcendentals=0, bytes_accessed=bytes_accessed),
    )(x1_t, A, x0, w_left, bl_col, wr_t, br_row)

    return out2d.reshape(B, L, Rout)


def bilinear_layer_ref(A, x0, x1, w_left, b_left, w_right, b_right):
    x1_a = jnp.einsum("bpq,bpr->bqr", x1, A)                              # x1^T @ A
    w2 = jnp.einsum("brq,lq->brl", jnp.swapaxes(x1_a, 1, 2), w_left) + b_left
    w2x0 = jnp.einsum("blr,brc->blc", jnp.swapaxes(w2, 1, 2), x0)
    out = jnp.einsum("blc,oc->blo", w2x0, w_right) + b_right
    return jax.nn.relu(out)


if __name__ == "__main__":
    # Small shapes consistent with the forward pass:
    B, P, R, Q, L, C, Rout = 2, 16, 16, 8, 32, 8, 16
    # LEFT_LINEAR:  Q -> L    (LEFT_LINEAR_ROW_DIM=8,  LEFT_LINEAR_COL_DIM=32)
    # RIGHT_LINEAR: C -> Rout (RIGHT_LINEAR_ROW_DIM=8, RIGHT_LINEAR_COL_DIM=16)

    key = jax.random.PRNGKey(0)
    kA, kx0, kx1, kwl, kbl, kwr, kbr = jax.random.split(key, 7)

    A = jax.random.normal(kA, (B, P, R), dtype=jnp.float32)
    x0 = jax.random.normal(kx0, (B, R, C), dtype=jnp.float32)
    x1 = jax.random.normal(kx1, (B, P, Q), dtype=jnp.float32)

    # Deterministic parameter init (shapes match nn.Linear: (out, in) + (out,))
    w_left = jax.random.normal(kwl, (L, Q), dtype=jnp.float32) * 0.1
    b_left = jax.random.normal(kbl, (L,), dtype=jnp.float32) * 0.1
    w_right = jax.random.normal(kwr, (Rout, C), dtype=jnp.float32) * 0.1
    b_right = jax.random.normal(kbr, (Rout,), dtype=jnp.float32) * 0.1

    out = bilinear_layer(A, x0, x1, w_left, b_left, w_right, b_right)
    out = jax.block_until_ready(out)

    ref = bilinear_layer_ref(A, x0, x1, w_left, b_left, w_right, b_right)
    assert out.shape == (B, L, Rout)
    assert jnp.allclose(out, ref, atol=1e-4, rtol=1e-4)

    print("KERNEL_OK")
</pallas_src>

<mosaic_0001>
module attributes {stable_mosaic.version = 11 : i64} {
  func.func @_bilinear_kernel(%arg0: i32, %arg1: memref<1x8x16xf32, #tpu.memory_space<vmem>>, %arg2: memref<1x16x16xf32, #tpu.memory_space<vmem>>, %arg3: memref<1x16x8xf32, #tpu.memory_space<vmem>>, %arg4: memref<32x8xf32, #tpu.memory_space<vmem>>, %arg5: memref<32x1xf32, #tpu.memory_space<vmem>>, %arg6: memref<8x16xf32, #tpu.memory_space<vmem>>, %arg7: memref<1x16xf32, #tpu.memory_space<vmem>>, %arg8: memref<32x16xf32, #tpu.memory_space<vmem>>, %arg9: memref<32x8xf32, #tpu.memory_space<vmem>>) attributes {dimension_semantics = [#tpu.dimension_semantics<parallel>], iteration_bounds = array<i64: 2>, scalar_prefetch = 0 : i64, scratch_operands = 1 : i64, tpu.core_type = #tpu.core_type<tc>, window_params = [{transform_indices = @transform_0, window_bounds = array<i64: 1, 8, 16>}, {transform_indices = @transform_1, window_bounds = array<i64: 1, 16, 16>}, {transform_indices = @transform_2, window_bounds = array<i64: 1, 16, 8>}, {pipeline_mode = #tpu.pipeline_mode<synchronous>, transform_indices = @transform_3, window_bounds = array<i64: 32, 8>}, {pipeline_mode = #tpu.pipeline_mode<synchronous>, transform_indices = @transform_4, window_bounds = array<i64: 32, 1>}, {pipeline_mode = #tpu.pipeline_mode<synchronous>, transform_indices = @transform_5, window_bounds = array<i64: 8, 16>}, {pipeline_mode = #tpu.pipeline_mode<synchronous>, transform_indices = @transform_6, window_bounds = array<i64: 1, 16>}, {transform_indices = @transform_7, window_bounds = array<i64: 32, 16>}]} {
    %c0 = arith.constant 0 : index
    %c0_0 = arith.constant 0 : index
    %0 = vector.load %arg4[%c0, %c0_0] : memref<32x8xf32, #tpu.memory_space<vmem>>, vector<32x8xf32>
    %c0_1 = arith.constant 0 : index
    %c0_2 = arith.constant 0 : index
    %1 = vector.load %arg5[%c0_1, %c0_2] : memref<32x1xf32, #tpu.memory_space<vmem>>, vector<32x1xf32>
    %c0_3 = arith.constant 0 : index
    %c0_4 = arith.constant 0 : index
    %c0_5 = arith.constant 0 : index
    %2 = vector.load %arg1[%c0_3, %c0_4, %c0_5] : memref<1x8x16xf32, #tpu.memory_space<vmem>>, vector<1x8x16xf32>
    %3 = vector.shape_cast %2 : vector<1x8x16xf32> to vector<8x16xf32>
    %c0_6 = arith.constant 0 : index
    %c0_7 = arith.constant 0 : index
    %c0_8 = arith.constant 0 : index
    %4 = vector.load %arg2[%c0_6, %c0_7, %c0_8] : memref<1x16x16xf32, #tpu.memory_space<vmem>>, vector<1x16x16xf32>
    %5 = vector.shape_cast %4 : vector<1x16x16xf32> to vector<16x16xf32>
    %cst = arith.constant dense<0.000000e+00> : vector<8x16xf32>
    %6 = tpu.matmul %3, %5, %cst {dimension_numbers = #tpu.dot_dimension_numbers<[1], [0], [0], [1], [0, 0, 1, 1], [], []>} : vector<8x16xf32>, vector<16x16xf32>, vector<8x16xf32> -> vector<8x16xf32>
    %cst_9 = arith.constant dense<0.000000e+00> : vector<32x16xf32>
    %7 = tpu.matmul %0, %6, %cst_9 {dimension_numbers = #tpu.dot_dimension_numbers<[1], [0], [0], [1], [0, 0, 1, 1], [], []>} : vector<32x8xf32>, vector<8x16xf32>, vector<32x16xf32> -> vector<32x16xf32>
    %8 = vector.broadcast %1 : vector<32x1xf32> to vector<32x16xf32>
    %9 = arith.addf %7, %8 : vector<32x16xf32>
    %c0_10 = arith.constant 0 : index
    %c0_11 = arith.constant 0 : index
    %c0_12 = arith.constant 0 : index
    %10 = vector.load %arg3[%c0_10, %c0_11, %c0_12] : memref<1x16x8xf32, #tpu.memory_space<vmem>>, vector<1x16x8xf32>
    %11 = vector.shape_cast %10 : vector<1x16x8xf32> to vector<16x8xf32>
    %cst_13 = arith.constant dense<0.000000e+00> : vector<32x8xf32>
    %12 = tpu.matmul %9, %11, %cst_13 {dimension_numbers = #tpu.dot_dimension_numbers<[1], [0], [0], [1], [0, 0, 1, 1], [], []>} : vector<32x16xf32>, vector<16x8xf32>, vector<32x8xf32> -> vector<32x8xf32>
    %c0_14 = arith.constant 0 : index
    %c0_15 = arith.constant 0 : index
    %13 = vector.load %arg9[%c0_14, %c0_15] : memref<32x8xf32, #tpu.memory_space<vmem>>, vector<32x8xf32>
    tpu.vector_store %arg9[%c0_14, %c0_15], %12 {strides = array<i32>} : memref<32x8xf32, #tpu.memory_space<vmem>>, vector<32x8xf32>,
    %c0_16 = arith.constant 0 : index
    %c0_17 = arith.constant 0 : index
    %14 = vector.load %arg9[%c0_16, %c0_17] : memref<32x8xf32, #tpu.memory_space<vmem>>, vector<32x8xf32>
    %c0_18 = arith.constant 0 : index
    %c0_19 = arith.constant 0 : index
    %15 = vector.load %arg6[%c0_18, %c0_19] : memref<8x16xf32, #tpu.memory_space<vmem>>, vector<8x16xf32>
    %cst_20 = arith.constant dense<0.000000e+00> : vector<32x16xf32>
    %16 = tpu.matmul %14, %15, %cst_20 {dimension_numbers = #tpu.dot_dimension_numbers<[1], [0], [0], [1], [0, 0, 1, 1], [], []>} : vector<32x8xf32>, vector<8x16xf32>, vector<32x16xf32> -> vector<32x16xf32>
    %c0_21 = arith.constant 0 : index
    %c0_22 = arith.constant 0 : index
    %17 = vector.load %arg7[%c0_21, %c0_22] : memref<1x16xf32, #tpu.memory_space<vmem>>, vector<1x16xf32>
    %18 = vector.broadcast %17 : vector<1x16xf32> to vector<32x16xf32>
    %19 = arith.addf %16, %18 : vector<32x16xf32>
    %cst_23 = arith.constant 0.000000e+00 : f32
    %20 = vector.broadcast %cst_23 : f32 to vector<32x16xf32>
    %21 = arith.maximumf %19, %20 : vector<32x16xf32>
    %c0_24 = arith.constant 0 : index
    %c0_25 = arith.constant 0 : index
    %22 = vector.load %arg8[%c0_24, %c0_25] : memref<32x16xf32, #tpu.memory_space<vmem>>, vector<32x16xf32>
    tpu.vector_store %arg8[%c0_24, %c0_25], %21 {strides = array<i32>} : memref<32x16xf32, #tpu.memory_space<vmem>>, vector<32x16xf32>,
    return
  }
  func.func @transform_0(%arg0: i32) -> (i32, i32, i32) {
    %c0_i32 = arith.constant 0 : i32
    %c0_i32_0 = arith.constant 0 : i32
    %c0_i32_1 = arith.constant 0 : i32
    return %arg0, %c0_i32, %c0_i32_0 : i32, i32, i32
  }
  func.func @transform_1(%arg0: i32) -> (i32, i32, i32) {
    %c0_i32 = arith.constant 0 : i32
    %c0_i32_0 = arith.constant 0 : i32
    %c0_i32_1 = arith.constant 0 : i32
    return %arg0, %c0_i32, %c0_i32_0 : i32, i32, i32
  }
  func.func @transform_2(%arg0: i32) -> (i32, i32, i32) {
    %c0_i32 = arith.constant 0 : i32
    %c0_i32_0 = arith.constant 0 : i32
    %c0_i32_1 = arith.constant 0 : i32
    return %arg0, %c0_i32, %c0_i32_0 : i32, i32, i32
  }
  func.func @transform_3(%arg0: i32) -> (i32, i32) {
    %c0_i32 = arith.constant 0 : i32
    %c0_i32_0 = arith.constant 0 : i32
    %c0_i32_1 = arith.constant 0 : i32
    return %c0_i32, %c0_i32_0 : i32, i32
  }
  func.func @transform_4(%arg0: i32) -> (i32, i32) {
    %c0_i32 = arith.constant 0 : i32
    %c0_i32_0 = arith.constant 0 : i32
    %c0_i32_1 = arith.constant 0 : i32
    return %c0_i32, %c0_i32_0 : i32, i32
  }
  func.func @transform_5(%arg0: i32) -> (i32, i32) {
    %c0_i32 = arith.constant 0 : i32
    %c0_i32_0 = arith.constant 0 : i32
    %c0_i32_1 = arith.constant 0 : i32
    return %c0_i32, %c0_i32_0 : i32, i32
  }
  func.func @transform_6(%arg0: i32) -> (i32, i32) {
    %c0_i32 = arith.constant 0 : i32
    %c0_i32_0 = arith.constant 0 : i32
    %c0_i32_1 = arith.constant 0 : i32
    return %c0_i32, %c0_i32_0 : i32, i32
  }
  func.func @transform_7(%arg0: i32) -> (i32, i32) {
    %c0_i32 = arith.constant 0 : i32
    %c0_i32_0 = arith.constant 0 : i32
    return %arg0, %c0_i32 : i32, i32
  }
}

</mosaic_0001>

<bundles_post_ra>
// kernel: tpu_custom_call.1
= control target key start
LH: loop header
LB: loop body
LE: loop exit
PB: predicated region body
PF: predicated region fallthrough
CT: control target
= control target key end

     0   :  { %s689_s24 = smov 0   ;;  %s776_s0 = inlined_call_operand.vmem [shape: f32[2,8,16], index: 0, kind: input, shape index: {}]   ;;  %s777_s1 = inlined_call_operand.vmem [shape: f32[2,16,16], index: 1, kind: input, shape index: {}]   ;;  %s778_s2 = inlined_call_operand.vmem [shape: f32[2,16,8], index: 2, kind: input, shape index: {}]   ;;  %s779_s3 = inlined_call_operand.vmem [shape: f32[32,8], index: 3, kind: input, shape index: {}]   ;;  %s780_s4 = inlined_call_operand.vmem [shape: f32[32,1], index: 4, kind: input, shape index: {}]   ;;  %s781_s5 = inlined_call_operand.vmem [shape: f32[8,16], index: 5, kind: input, shape index: {}]   ;;  %s782_s6 = inlined_call_operand.vmem [shape: f32[1,16], index: 6, kind: input, shape index: {}]   ;;  %s783_s7 = inlined_call_operand.vmem [shape: f32[64,16], index: 7, kind: output, shape index: {}]  }
   0x1 LB: > { %s695_s25 = sadd.s32 4294967295, %s646_s24   ;;  %p603_p0 = scmp.ge.s32.totalorder %s646_s24, 1  ;;  %s646_s24 = sphi %s689_s24, %s17_s24  }
   0x2   : > { %p256_p1 = scmp.lt.s32.totalorder %s646_s24, 3 }
   0x4   : > { %p257_p2 = pnand %p603_p0, %p256_p1 }
   0x5   : > { %p297_p3 = scmp.lt.s32.totalorder (!%p257_p2), %s695_s25, 1  ;;  %s609_s12 = sshll.u32 (!%p257_p2), %s695_s25, 2 }
   0x6   : > { %260 = sbr.rel (%p257_p2) target bundleno = 575 (0x23f), region = 48  ;;  %p312_p4 = scmp.lt.s32.totalorder (!%p257_p2), %s609_s12, 7 }
   0xb   : > { %s701_s26 = scalar_select %p297_p3, %s695_s25, 1  ;;  %vm328_vm0 = vcmask 130048   ;;  %v321_v3 = vld [vmem:[%s780_s4] sm:$0xff]  ;;  %v648_v4 = vmov 0   ;;  %v322_v5 = vld [vmem:[%s780_s4 + $0x8] sm:$0xff]  ;;  %v323_v6 = vld [vmem:[%s780_s4 + $0x10] sm:$0xff] }
   0xc   : > { %637 = vset.pattern.permute.xlu0 %v648_v4  ;;  %638 = vset.pattern.permute.xlu1 %v648_v4  ;;  %v324_v7 = vld [vmem:[%s780_s4 + $0x18] sm:$0xff]  ;;  %v317_v8 = vld [vmem:[%s779_s3] sm:$0xff]  ;;  %vm372_vm1 = vcmask 64512   ;;  %v318_v10 = vld [vmem:[%s779_s3 + $0x8] sm:$0xff]  ;;  %s785_s12 = smov (!%p312_p4, %s609_s12), 7 }
   0xd   : > { %s626_s27 = sshll.u32 %s701_s26, 4  ;;  %s604_s28 = sshll.u32 %s701_s26, 3  ;;  %354 = vperm.xlu0 %637, %v321_v3   ;;  %364 = vperm.xlu1 %638, %v323_v6   ;;  %v319_v11 = vld [vmem:[%s779_s3 + $0x10] sm:$0xff]  ;;  %v320_v12 = vld [vmem:[%s779_s3 + $0x18] sm:$0xff]  ;;  %v465_v27 = vld [vmem:[%s781_s5] sm:$0xff] }
   0xe   : > { %s305_s8 = scalar_lea.vmem %s777_s1, %s626_s27  ;;  %s300_s11 = scalar_lea.vmem %s776_s0, %s604_s28  ;;  %497 = vmatpush.msra.mxu3 %v465_v27  ;;  %v639_v36 = vld [vmem:[%s782_s6] ss:$0 sm:$0xff] }
   0xf   : > { %v327_v0 = vld [vmem:[%s305_s8 + $0x8] sm:$0xff]  ;;  %v326_v1 = vld [vmem:[%s305_s8] sm:$0xff]  ;;  %s610_s15 = sshll.u32 %s785_s12, 3 }
  0x10   : > { %346 = vmatpush.msra.mxu0 %v327_v0  ;;  %v325_v2 = vld [vmem:[%s300_s11] sm:$0xff]  ;;  %s310_s11 = scalar_lea.vmem %s778_s2, %s626_s27  ;;  %s315_s18 = scalar_lea.vmem %s783_s7, %s610_s15 }
  0x11   : > { %v415_v13 = vld [vmem:[%s310_s11 + $0x8] sm:$0xff]  ;;  %v414_v14 = vld [vmem:[%s310_s11] sm:$0xff] }
  0x12   : > { %347 = vmatpush.msra.mxu0 %v326_v1  ;;  %442 = vmatpush.msra.mxu2 %v415_v13 }
  0x13   : > { %611 = vmatmul.msk.f32.vlgmr.msra.gmra.mxu0 %vm328_vm0, %v325_v2 }
  0x14   : > { %443 = vmatpush.msra.mxu2 %v414_v14 }
  0x15   : > { %359 = vperm.xlu0 %637, %v322_v5   ;;  %369 = vperm.xlu1 %638, %v324_v7  }
  0x7f   : > { %v355_v15 = vpop.permute.xlu0 %354  ;;  %v365_v21 = vpop.permute.xlu1 %364 }
  0x87   : > { %v360_v18 = vpop.permute.xlu0 %359  ;;  %v370_v24 = vpop.permute.xlu1 %369 }
  0x90   : > { %v349_v9 = vpop.f32.mrf.mxu0 }
  0x91   : > { %400 = vmatpush.msra.mxu1 %v349_v9 }
  0x92   : > { %612 = vmatmul.msk.f32.vlgmr.msra.gmra.mxu1 %vm372_vm1, %v317_v8 }
  0x9a   : > { %613 = vmatmul.msk.f32.gmra.mxu1 %vm372_vm1, %v318_v10 }
  0xa2   : > { %614 = vmatmul.msk.f32.gmra.mxu1 %vm372_vm1, %v319_v11 }
  0xaa   : > { %615 = vmatmul.msk.f32.gmra.mxu1 %vm372_vm1, %v320_v12 }
 0x10f   : > { %v402_v16 = vpop.f32.mrf.mxu1 }
 0x110   : > { %v403_v17 = vadd.f32 %v402_v16, %v355_v15 }
 0x112   : > { %616 = vmatmul.msk.f32.vlgmr.msra.gmra.mxu2 %vm328_vm0, %v403_v17 }
 0x117   : > { %v405_v19 = vpop.f32.mrf.mxu1 }
 0x118   : > { %v406_v20 = vadd.f32 %v405_v19, %v360_v18 }
 0x11a   : > { %617 = vmatmul.msk.f32.gmra.mxu2 %vm328_vm0, %v406_v20 }
 0x11f   : > { %v408_v22 = vpop.f32.mrf.mxu1 }
 0x120   : > { %v409_v23 = vadd.f32 %v408_v22, %v365_v21 }
 0x122   : > { %618 = vmatmul.msk.f32.gmra.mxu2 %vm328_vm0, %v409_v23 }
 0x127   : > { %v411_v25 = vpop.f32.mrf.mxu1 }
 0x128   : > { %v412_v26 = vadd.f32 %v411_v25, %v370_v24 }
 0x12a   : > { %619 = vmatmul.msk.f32.gmra.mxu2 %vm328_vm0, %v412_v26 }
 0x195   : > { %v445_v28 = vpop.f32.mrf.mxu2 }
 0x196   : > { %457 = vst.msk [vmem:[#allocation2] sm:$0xff] %vm372_vm1, %v445_v28 }
 0x19d   : > { %v448_v29 = vpop.f32.mrf.mxu2  ;;  %v461_v30 = vld [vmem:[#allocation2] sm:$0xff] }
 0x19e   : > { %458 = vst.msk [vmem:[#allocation2 + $0x8] sm:$0xff] %vm372_vm1, %v448_v29  ;;  %620 = vmatmul.msk.f32.vlgmr.msra.gmra.mxu3 %vm372_vm1, %v461_v30 }
 0x1a5   : > { %v451_v31 = vpop.f32.mrf.mxu2  ;;  %v462_v32 = vld [vmem:[#allocation2 + $0x8] sm:$0xff] }
 0x1a6   : > { %459 = vst.msk [vmem:[#allocation2 + $0x10] sm:$0xff] %vm372_vm1, %v451_v31  ;;  %621 = vmatmul.msk.f32.gmra.mxu3 %vm372_vm1, %v462_v32 }
 0x1ad   : > { %v454_v33 = vpop.f32.mrf.mxu2  ;;  %v463_v34 = vld [vmem:[#allocation2 + $0x10] sm:$0xff] }
 0x1ae   : > { %460 = vst.msk [vmem:[#allocation2 + $0x18] sm:$0xff] %vm372_vm1, %v454_v33  ;;  %622 = vmatmul.msk.f32.gmra.mxu3 %vm372_vm1, %v463_v34 }
 0x1b5   : > { %v464_v35 = vld [vmem:[#allocation2 + $0x18] sm:$0xff] }
 0x1b6   : > { %623 = vmatmul.msk.f32.gmra.mxu3 %vm372_vm1, %v464_v35 }
 0x221   : > { %v499_v37 = vpop.f32.mrf.mxu3 }
 0x222   : > { %v500_v38 = vadd.f32 %v639_v36, %v499_v37 }
 0x224   : > { %v511_v39 = vmax.f32 %v500_v38, 0.0 }
 0x226   : > { %515 = vst.msk [vmem:[%s315_s18] sm:$0xff] %vm328_vm0, %v511_v39 }
 0x229   : > { %v502_v40 = vpop.f32.mrf.mxu3 }
 0x22a   : > { %v503_v41 = vadd.f32 %v639_v36, %v502_v40 }
 0x22c   : > { %v512_v42 = vmax.f32 %v503_v41, 0.0 }
 0x22e   : > { %516 = vst.msk [vmem:[%s315_s18 + $0x8] sm:$0xff] %vm328_vm0, %v512_v42 }
 0x231   : > { %v505_v43 = vpop.f32.mrf.mxu3 }
 0x232   : > { %v506_v44 = vadd.f32 %v639_v36, %v505_v43 }
 0x234   : > { %v513_v45 = vmax.f32 %v506_v44, 0.0 }
 0x236   : > { %517 = vst.msk [vmem:[%s315_s18 + $0x10] sm:$0xff] %vm328_vm0, %v513_v45 }
 0x239   : > { %v508_v46 = vpop.f32.mrf.mxu3 }
 0x23a   : > { %v509_v47 = vadd.f32 %v639_v36, %v508_v46 }
 0x23c   : > { %v514_v48 = vmax.f32 %v509_v47, 0.0 }
 0x23e   : > { %518 = vst.msk [vmem:[%s315_s18 + $0x18] sm:$0xff] %vm328_vm0, %v514_v48 }
 0x23f PF: > { %s17_s24 = sadd.s32 1, %s646_s24  }
 0x240   : > { %p14_p5 = scmp.ge.s32.totalorder %s17_s24, 4  }
 0x242   :  { %16 = sbr.rel (!%p14_p5) target bundleno = 1 (0x1), region = 84 }

</bundles_post_ra>
